<compile_context>
chip_gen: v7x
topology: tpu7x:2x2x1
jax: 0.10.0
libtpu: 0.0.40
codegen_flags: <defaults>
</compile_context>

<pallas_src>
import math
import functools

import jax
import jax.numpy as jnp
from jax.experimental import pallas as pl
from jax.experimental.pallas import tpu as pltpu

_INV_SQRT2 = 1.0 / math.sqrt(2.0)


# ---------------------------------------------------------------------------
# Kernel
# ---------------------------------------------------------------------------
def _mlp_kernel(x_ref, w1_ref, t1_ref, w2_ref, t2_ref, o_ref, h_ref, *, approx_gelu):
    # x_ref : (Cin,   T)    f32   (batch dim squeezed out by the BlockSpec)
    # w1_ref: (Hd_p,  Cin)  bf16  (BN1 + fc1 bias folded in)
    # t1_ref: (Hd_p,  1)    f32
    # w2_ref: (Cout,  Hd_p) bf16  (BN2 + fc2 bias folded in)
    # t2_ref: (Cout,  1)    f32
    # o_ref : (Cout,  T)    f32   (lane-dense: T is a multiple of 128 or == H*W)
    # h_ref : (Hd_p,  T)    bf16  VMEM staging for the fc1 output
    x = x_ref[...].astype(jnp.bfloat16)                      # in-kernel cast
    h = jnp.dot(w1_ref[...], x, preferred_element_type=jnp.float32)
    h = h + t1_ref[...]                                      # per-sublane bias, broadcast over lanes
    if approx_gelu:
        # tanh-form GELU: single EUP transcendental (frees the VALU slot on v6e/v7x)
        h = jax.nn.gelu(h, approximate=True)
    else:
        # exact erf GELU: parity with PyTorch nn.GELU() default
        h = 0.5 * h * (1.0 + jax.lax.erf(h * _INV_SQRT2))
    # stage through VMEM as bf16 so the second matmul streams bf16 operands
    h_ref[...] = h.astype(jnp.bfloat16)
    y = jnp.dot(w2_ref[...], h_ref[...], preferred_element_type=jnp.float32)
    o_ref[...] = (y + t2_ref[...]).astype(o_ref.dtype)


# ---------------------------------------------------------------------------
# Tiling / VMEM helpers
# ---------------------------------------------------------------------------
def _round_up(x, m):
    return (x + m - 1) // m * m


def _vmem_limit_bytes():
    """Generation-aware VMEM limit: ~70% of physical (≈90 MiB v5e/v6e, ≈45 MiB v7x)."""
    try:
        cap = int(pltpu.get_tpu_info().vmem_capacity_bytes)
    except Exception:            # conservative fallback: smallest per-core VMEM (v7x)
        cap = 64 << 20
    return min(int(cap * 0.7), 100 << 20)


def _pick_tile_hw(hw, cin, hd_pad, cout, vmem_limit, max_tile=2048, lane=128):
    """Spatial-column tile: largest multiple of 128 (or the full H*W) that fits the
    VMEM budget, minimising padded-column waste in the non-divisible case."""
    def blk(rows, cols, itemsize):       # padded VMEM footprint of one buffer
        return _round_up(rows, 8) * _round_up(cols, lane) * itemsize

    # constant operands (double-buffered by the BlockSpec pipeline)
    weight_bytes = 2 * (blk(hd_pad, cin, 2) + blk(cout, hd_pad, 2)
                        + blk(hd_pad, 1, 4) + blk(cout, 1, 4))
    headroom = 2 << 20
    # per spatial column: f32 x (x2 buffers) + f32 out (x2 buffers) + bf16 h scratch (x1)
    per_col = 2 * 4 * _round_up(cin, 8) + 2 * 4 * _round_up(cout, 8) + 2 * hd_pad
    budget = vmem_limit - headroom - weight_bytes
    if budget < per_col * lane:
        raise ValueError(
            f"Mlp weights + minimum tile do not fit the VMEM limit ({vmem_limit} B); "
            "hidden dim too large for this kernel.")

    cap = min(max_tile, budget // per_col)
    cap = max((cap // lane) * lane, lane)
    if hw <= cap:
        return hw                        # single spatial tile per batch, zero padding
    # Largest multiple-of-128 tile <= cap that minimises total padded columns
    # (ties broken toward larger tiles -> fewer ~0.35 us grid steps).
    best_t, best_total = lane, None
    for t in range(cap, lane - 1, -lane):
        total = -(-hw // t) * t
        if best_total is None or total < best_total:
            best_t, best_total = t, total
    return best_t


# ---------------------------------------------------------------------------
# Wrapper
# ---------------------------------------------------------------------------
def mlp_pallas(x_nchw, kparams, approx_gelu=False):
    """x_nchw: (B, Cin, H, W) float32.  Returns (B, Cout, H, W)."""
    w1, t1, w2, t2 = kparams                 # pre-folded, hidden-padded, bf16/f32
    B, Cin, H, W = x_nchw.shape
    Hd_pad = w1.shape[0]
    Cout = w2.shape[0]
    S = H * W

    x = x_nchw.reshape(B, Cin, S)            # channels-first: reshape only, no transpose

    vmem_limit = _vmem_limit_bytes()
    tile = _pick_tile_hw(S, Cin, Hd_pad, Cout, vmem_limit)
    grid = (B, pl.cdiv(S, tile))             # any trailing partial tile is clamped by Pallas;
                                              # garbage columns stay column-local and are dropped.

    x_spec = pl.BlockSpec((None, Cin, tile), lambda b, j: (b, 0, j))
    o_spec = pl.BlockSpec((None, Cout, tile), lambda b, j: (b, 0, j))
    const = lambda shape: pl.BlockSpec(shape, lambda b, j: (0,) * len(shape))

    n_pix = B * S
    cost = pl.CostEstimate(
        flops=int(2 * n_pix * (Cin * Hd_pad + Hd_pad * Cout)),
        transcendentals=int(n_pix * Hd_pad),
        bytes_accessed=int(4 * n_pix * (Cin + Cout)
                           + 2 * (w1.size + w2.size) + 4 * (t1.size + t2.size)),
    )

    out = pl.pallas_call(
        functools.partial(_mlp_kernel, approx_gelu=approx_gelu),
        out_shape=jax.ShapeDtypeStruct((B, Cout, S), x_nchw.dtype),
        grid=grid,
        in_specs=[
            x_spec,
            const((Hd_pad, Cin)), const((Hd_pad, 1)),
            const((Cout, Hd_pad)), const((Cout, 1)),
        ],
        out_specs=o_spec,
        scratch_shapes=[pltpu.VMEM((Hd_pad, tile), jnp.bfloat16)],
        compiler_params=pltpu.CompilerParams(
            dimension_semantics=("parallel", "parallel"),
            vmem_limit_bytes=int(vmem_limit)),
        cost_estimate=cost,
    )(x, w1, t1, w2, t2)

    return out.reshape(B, Cout, H, W)


# ---------------------------------------------------------------------------
# Parameters
# ---------------------------------------------------------------------------
def make_params(key, in_features, hidden_features, out_features):
    """Deterministic synthetic parameters mirroring the PyTorch module."""
    ks = jax.random.split(key, 10)
    # Conv2d 1x1 weights (out, in, 1, 1); trunc_normal_(std=0.02), bias=0
    fc1_w = jax.random.normal(ks[0], (hidden_features, in_features, 1, 1), jnp.float32) * 0.02
    fc1_b = jnp.zeros((hidden_features,), jnp.float32)
    fc2_w = jax.random.normal(ks[1], (out_features, hidden_features, 1, 1), jnp.float32) * 0.02
    fc2_b = jnp.zeros((out_features,), jnp.float32)
    # BatchNorm2d params / running stats (synthetic, non-trivial, deterministic)
    g1 = 1.0 + 0.1 * jax.random.normal(ks[2], (hidden_features,), jnp.float32)
    be1 = 0.1 * jax.random.normal(ks[3], (hidden_features,), jnp.float32)
    m1 = 0.1 * jax.random.normal(ks[4], (hidden_features,), jnp.float32)
    v1 = jnp.abs(jax.random.normal(ks[5], (hidden_features,), jnp.float32)) + 0.5
    g2 = 1.0 + 0.1 * jax.random.normal(ks[6], (out_features,), jnp.float32)
    be2 = 0.1 * jax.random.normal(ks[7], (out_features,), jnp.float32)
    m2 = 0.1 * jax.random.normal(ks[8], (out_features,), jnp.float32)
    v2 = jnp.abs(jax.random.normal(ks[9], (out_features,), jnp.float32)) + 0.5
    return (fc1_w, fc1_b, g1, be1, m1, v1, fc2_w, fc2_b, g2, be2, m2, v2)


def prepare_kernel_params(raw, eps=1e-5, lane=128):
    """One-time transform: fold conv bias + BatchNorm into channels-first weights,
    pad only the hidden dim to a multiple of 128, cast weights to bf16."""
    (fc1_w, fc1_b, g1, be1, m1, v1, fc2_w, fc2_b, g2, be2, m2, v2) = raw
    Hd = fc1_w.shape[0]
    s1 = g1 / jnp.sqrt(v1 + eps)
    s2 = g2 / jnp.sqrt(v2 + eps)
    # BN(conv(x)) = (s*W) x + (s*b + beta - s*m), channels-first orientation.
    w1 = fc1_w[:, :, 0, 0] * s1[:, None]             # (Hd, Cin)
    t1 = s1 * fc1_b + be1 - s1 * m1                  # (Hd,)
    w2 = fc2_w[:, :, 0, 0] * s2[:, None]             # (Cout, Hd)
    t2 = s2 * fc2_b + be2 - s2 * m2                  # (Cout,)

    Hd_pad = _round_up(Hd, lane)
    w1 = jnp.pad(w1, ((0, Hd_pad - Hd), (0, 0)))
    t1 = jnp.pad(t1, (0, Hd_pad - Hd))
    w2 = jnp.pad(w2, ((0, 0), (0, Hd_pad - Hd)))
    # note: Cin / Cout left unpadded (they are full array dims of the blocks)
    return (w1.astype(jnp.bfloat16), t1[:, None].astype(jnp.float32),
            w2.astype(jnp.bfloat16), t2[:, None].astype(jnp.float32))


def mlp_reference(x_nchw, raw, eps=1e-5):
    """Pure-JAX f32 reference of the original (unfolded) module math."""
    (fc1_w, fc1_b, g1, be1, m1, v1, fc2_w, fc2_b, g2, be2, m2, v2) = raw
    B, Cin, H, W = x_nchw.shape
    x = jnp.transpose(x_nchw, (0, 2, 3, 1)).reshape(-1, Cin)
    h = x @ jnp.transpose(fc1_w[:, :, 0, 0], (1, 0)) + fc1_b
    h = (h - m1) / jnp.sqrt(v1 + eps) * g1 + be1
    h = 0.5 * h * (1.0 + jax.lax.erf(h * _INV_SQRT2))
    y = h @ jnp.transpose(fc2_w[:, :, 0, 0], (1, 0)) + fc2_b
    y = (y - m2) / jnp.sqrt(v2 + eps) * g2 + be2
    return jnp.transpose(y.reshape(B, H, W, -1), (0, 3, 1, 2))


if __name__ == "__main__":
    key = jax.random.PRNGKey(0)
    k_x, k_p = jax.random.split(key)

    B, Cin, H, W = 2, 4, 16, 16
    hidden, Cout = 32, 4          # out_features defaults to in_features

    x = jax.random.normal(k_x, (B, Cin, H, W), jnp.float32)
    raw_params = make_params(k_p, Cin, hidden, Cout)
    kparams = prepare_kernel_params(raw_params)

    run = jax.jit(lambda xx: mlp_pallas(xx, kparams))
    out = jax.block_until_ready(run(x))

    ref = mlp_reference(x, raw_params)
    assert out.shape == (B, Cout, H, W)
    # bf16 matmul inputs -> loosened tolerance vs the f32 reference
    assert jnp.allclose(out, ref, atol=2e-2, rtol=2e-2), "mismatch vs reference"

    print("KERNEL_OK")
</pallas_src>

<mosaic_0001>
module attributes {stable_mosaic.version = 11 : i64} {
  func.func @_mlp_kernel(%arg0: i32, %arg1: i32, %arg2: memref<1x4x256xf32, #tpu.memory_space<vmem>>, %arg3: memref<128x4xbf16, #tpu.memory_space<vmem>>, %arg4: memref<128x1xf32, #tpu.memory_space<vmem>>, %arg5: memref<4x128xbf16, #tpu.memory_space<vmem>>, %arg6: memref<4x1xf32, #tpu.memory_space<vmem>>, %arg7: memref<1x4x256xf32, #tpu.memory_space<vmem>>, %arg8: memref<128x256xbf16, #tpu.memory_space<vmem>>) attributes {dimension_semantics = [#tpu.dimension_semantics<parallel>, #tpu.dimension_semantics<parallel>], iteration_bounds = array<i64: 2, 1>, scalar_prefetch = 0 : i64, scratch_operands = 1 : i64, tpu.core_type = #tpu.core_type<tc>, window_params = [{transform_indices = @transform_0, window_bounds = array<i64: 1, 4, 256>}, {pipeline_mode = #tpu.pipeline_mode<synchronous>, transform_indices = @transform_1, window_bounds = array<i64: 128, 4>}, {pipeline_mode = #tpu.pipeline_mode<synchronous>, transform_indices = @transform_2, window_bounds = array<i64: 128, 1>}, {pipeline_mode = #tpu.pipeline_mode<synchronous>, transform_indices = @transform_3, window_bounds = array<i64: 4, 128>}, {pipeline_mode = #tpu.pipeline_mode<synchronous>, transform_indices = @transform_4, window_bounds = array<i64: 4, 1>}, {transform_indices = @transform_5, window_bounds = array<i64: 1, 4, 256>}]} {
    %c0 = arith.constant 0 : index
    %c0_0 = arith.constant 0 : index
    %c0_1 = arith.constant 0 : index
    %0 = vector.load %arg2[%c0, %c0_0, %c0_1] : memref<1x4x256xf32, #tpu.memory_space<vmem>>, vector<1x4x256xf32>
    %1 = vector.shape_cast %0 : vector<1x4x256xf32> to vector<4x256xf32>
    %2 = arith.truncf %1 : vector<4x256xf32> to vector<4x256xbf16>
    %c0_2 = arith.constant 0 : index
    %c0_3 = arith.constant 0 : index
    %3 = vector.load %arg3[%c0_2, %c0_3] : memref<128x4xbf16, #tpu.memory_space<vmem>>, vector<128x4xbf16>
    %cst = arith.constant dense<0.000000e+00> : vector<128x256xf32>
    %4 = tpu.matmul %3, %2, %cst {dimension_numbers = #tpu.dot_dimension_numbers<[1], [0], [0], [1], [0, 0, 1, 1], [], []>} : vector<128x4xbf16>, vector<4x256xbf16>, vector<128x256xf32> -> vector<128x256xf32>
    %c0_4 = arith.constant 0 : index
    %c0_5 = arith.constant 0 : index
    %5 = vector.load %arg4[%c0_4, %c0_5] : memref<128x1xf32, #tpu.memory_space<vmem>>, vector<128x1xf32>
    %6 = vector.broadcast %5 : vector<128x1xf32> to vector<128x256xf32>
    %7 = arith.addf %4, %6 : vector<128x256xf32>
    %cst_6 = arith.constant 5.000000e-01 : f32
    %8 = vector.broadcast %cst_6 : f32 to vector<128x256xf32>
    %9 = arith.mulf %8, %7 : vector<128x256xf32>
    %cst_7 = arith.constant 0.707106769 : f32
    %10 = vector.broadcast %cst_7 : f32 to vector<128x256xf32>
    %11 = arith.mulf %7, %10 : vector<128x256xf32>
    %12 = math.erf %11 : vector<128x256xf32>
    %cst_8 = arith.constant 1.000000e+00 : f32
    %13 = vector.broadcast %cst_8 : f32 to vector<128x256xf32>
    %14 = arith.addf %13, %12 : vector<128x256xf32>
    %15 = arith.mulf %9, %14 : vector<128x256xf32>
    %16 = arith.truncf %15 : vector<128x256xf32> to vector<128x256xbf16>
    %c0_9 = arith.constant 0 : index
    %c0_10 = arith.constant 0 : index
    %17 = vector.load %arg8[%c0_9, %c0_10] : memref<128x256xbf16, #tpu.memory_space<vmem>>, vector<128x256xbf16>
    tpu.vector_store %arg8[%c0_9, %c0_10], %16 {strides = array<i32>} : memref<128x256xbf16, #tpu.memory_space<vmem>>, vector<128x256xbf16>,
    %c0_11 = arith.constant 0 : index
    %c0_12 = arith.constant 0 : index
    %18 = vector.load %arg5[%c0_11, %c0_12] : memref<4x128xbf16, #tpu.memory_space<vmem>>, vector<4x128xbf16>
    %c0_13 = arith.constant 0 : index
    %c0_14 = arith.constant 0 : index
    %19 = vector.load %arg8[%c0_13, %c0_14] : memref<128x256xbf16, #tpu.memory_space<vmem>>, vector<128x256xbf16>
    %cst_15 = arith.constant dense<0.000000e+00> : vector<4x256xf32>
    %20 = tpu.matmul %18, %19, %cst_15 {dimension_numbers = #tpu.dot_dimension_numbers<[1], [0], [0], [1], [0, 0, 1, 1], [], []>} : vector<4x128xbf16>, vector<128x256xbf16>, vector<4x256xf32> -> vector<4x256xf32>
    %c0_16 = arith.constant 0 : index
    %c0_17 = arith.constant 0 : index
    %21 = vector.load %arg6[%c0_16, %c0_17] : memref<4x1xf32, #tpu.memory_space<vmem>>, vector<4x1xf32>
    %22 = vector.broadcast %21 : vector<4x1xf32> to vector<4x256xf32>
    %23 = arith.addf %20, %22 : vector<4x256xf32>
    %c0_18 = arith.constant 0 : index
    %c0_19 = arith.constant 0 : index
    %c0_20 = arith.constant 0 : index
    %24 = vector.load %arg7[%c0_18, %c0_19, %c0_20] : memref<1x4x256xf32, #tpu.memory_space<vmem>>, vector<1x4x256xf32>
    %25 = vector.shape_cast %24 : vector<1x4x256xf32> to vector<4x256xf32>
    %26 = vector.shape_cast %23 : vector<4x256xf32> to vector<1x4x256xf32>
    tpu.vector_store %arg7[%c0_18, %c0_19, %c0_20], %26 {strides = array<i32>} : memref<1x4x256xf32, #tpu.memory_space<vmem>>, vector<1x4x256xf32>,
    return
  }
  func.func @transform_0(%arg0: i32, %arg1: i32) -> (i32, i32, i32) {
    %c0_i32 = arith.constant 0 : i32
    %c0_i32_0 = arith.constant 0 : i32
    return %arg0, %c0_i32, %arg1 : i32, i32, i32
  }
  func.func @transform_1(%arg0: i32, %arg1: i32) -> (i32, i32) {
    %c0_i32 = arith.constant 0 : i32
    %c0_i32_0 = arith.constant 0 : i32
    %c0_i32_1 = arith.constant 0 : i32
    return %c0_i32, %c0_i32_0 : i32, i32
  }
  func.func @transform_2(%arg0: i32, %arg1: i32) -> (i32, i32) {
    %c0_i32 = arith.constant 0 : i32
    %c0_i32_0 = arith.constant 0 : i32
    %c0_i32_1 = arith.constant 0 : i32
    return %c0_i32, %c0_i32_0 : i32, i32
  }
  func.func @transform_3(%arg0: i32, %arg1: i32) -> (i32, i32) {
    %c0_i32 = arith.constant 0 : i32
    %c0_i32_0 = arith.constant 0 : i32
    %c0_i32_1 = arith.constant 0 : i32
    return %c0_i32, %c0_i32_0 : i32, i32
  }
  func.func @transform_4(%arg0: i32, %arg1: i32) -> (i32, i32) {
    %c0_i32 = arith.constant 0 : i32
    %c0_i32_0 = arith.constant 0 : i32
    %c0_i32_1 = arith.constant 0 : i32
    return %c0_i32, %c0_i32_0 : i32, i32
  }
  func.func @transform_5(%arg0: i32, %arg1: i32) -> (i32, i32, i32) {
    %c0_i32 = arith.constant 0 : i32
    %c0_i32_0 = arith.constant 0 : i32
    return %arg0, %c0_i32, %arg1 : i32, i32, i32
  }
}

</mosaic_0001>

<bundles_post_ra>
// kernel: _lambda_.1
= control target key start
LH: loop header
LB: loop body
LE: loop exit
PB: predicated region body
PF: predicated region fallthrough
CT: control target
= control target key end

     0   :  { %10 = vsyncpa [#allocation4], 0  ;;  %s1178_s18 = smov 0   ;;  %s1180_s19 = smov 0   ;;  %s1410_s0 = inlined_call_operand.vmem [shape: f32[2,4,256], index: 0, kind: input, shape index: {}]   ;;  %s1411_s1 = inlined_call_operand.hbm [shape: bf16[128,4], index: 1, kind: input, shape index: {}]   ;;  %s1412_s2 = inlined_call_operand.vmem [shape: f32[128,1], index: 2, kind: input, shape index: {}]   ;;  %s1413_s3 = inlined_call_operand.vmem [shape: bf16[4,128], index: 3, kind: input, shape index: {}]   ;;  %s1414_s4 = inlined_call_operand.vmem [shape: f32[4,1], index: 4, kind: input, shape index: {}]   ;;  %s1415_s5 = inlined_call_operand.vmem [shape: f32[2,4,256], index: 5, kind: output, shape index: {}]  }
   0x1   :  { %s1182_s20 = smov 0  }
   0x2 LB: > { %s943_s21 = sadd.s32 4294967295, %s1142_s20   ;;  %s28_s22 = sadd.s32 1, %s1138_s19  ;;  %s1142_s20 = sphi %s1182_s20, %s16_s20   ;;  %s1138_s19 = sphi %s1180_s19, %s1425_s19   ;;  %s1134_s18 = sphi %s1178_s18, %s1424_s18  }
   0x3   : > { %p30_p0 = scmp.ge.s32.totalorder %s28_s22, 2  ;;  %p945_p1 = scmp.ge.s32.totalorder %s1142_s20, 1 }
   0x4   : > { %p173_p2 = scmp.lt.s32.totalorder %s1142_s20, 3  ;;  %p1203_p4 = scmp.eq.s32.totalorder %s943_s21, 0 }
   0x5   : > { %s1427_s22 = smov (%p30_p0, %s28_s22), 0  ;;  %s1144_s25 = smov [#allocation3]  }
   0x6   : > { %p1199_p3 = pnand %p945_p1, %p173_p2  ;;  %s185_s26 = sshll.u32 %s1144_s25, 4  ;;  %s186_s26 = int_to_ptr.vmem [resolvable:$true] %s185_s26 }
   0x7   : > { %s1420_s24 = scalar_select %p1203_p4, 1, 0 }
   0x8   : > { %s1419_s23 = scalar_select %p1199_p3, 1, 0 }
   0x9   : > { %p979_p5 = pneg %p1199_p3  ;;  %s1088_s30 = scalar_lea.hbm %s1411_s1, 1024 }
   0xa   : > { %p1089_p7 = scmp.ne.s32.totalorder %s1411_s1, %s1088_s30  ;;  %p1095_p11 = scmp.lt.u32.totalorder %s1088_s30, %s1411_s1 }
   0xb   : > { %p1211_p6 = pnand %p1203_p4, %p979_p5 }
   0xd   : > { %p1090_p8 = pneg %p1211_p6 }
   0xf   : > { %p1091_p9 = pnand %p1090_p8, %p1089_p7 }
  0x11   : > { %p1092_p10 = pneg %p1091_p9 }
  0x13   : > { %p1097_p12 = pnand %p1095_p11, %p1092_p10 }
  0x15   : > { %1100 = shalt.err (!%p1097_p12)
}
  0x16   : > { %s1101_s10 = scalar_lea.vmem %s186_s26, 1024  ;;  %p1109_p2 = scmp.lt.s32.totalorder %s186_s26, %s186_s26 }
  0x17   : > { %p1102_p13 = scmp.ne.s32.totalorder %s186_s26, %s1101_s10  ;;  %p1110_p5 = scmp.lt.s32.totalorder %s1101_s10, %s1101_s10 }
  0x19   : > { %p1104_p0 = pnand %p1102_p13, %p1090_p8  ;;  %p1111_p4 = por %p1110_p5, %p1109_p2 }
  0x1b   : > { %p1105_p1 = pneg %p1104_p0 }
  0x1d   : > { %p1112_p3 = pnand %p1111_p4, %p1105_p1 }
  0x1f   : > { %1115 = shalt.err (!%p1112_p3)
}
  0x20   : > { %s1145_s11 = smov 64   ;;  %s1146_s12 = smov 4  }
  0x21   : > { %982 = dma.hbm_to_vmem [thread:$0]  (!%p1211_p6), %s1411_s1, 1024, %s186_s26, [#allocation4], %s1145_s11, %s1145_s11, %s1146_s12  }
  0x22   : > { %p1422_p7 = scmp.ne.s32.totalorder %s1419_s23, 0 }
  0x23   : > { %p1423_p9 = scmp.ne.s32.totalorder (!%p1422_p7), %s1420_s24, 0 }
  0x24   : > { %223 = sbr.rel (%p1422_p7) target bundleno = 572 (0x23c), region = 40 }
  0x2b   : > { %1129 = dma.done.wait (%p1423_p9), [#allocation4], 1024  }
  0x2c   : > { %1131 = vsyncadd (%p1423_p9), [#allocation4], 4294966272  ;;  %p260_p3 = scmp.lt.s32.totalorder %s1134_s18, 1  ;;  %v1147_v0 = vmov 0   ;;  %vm463_vm0 = vcmask 1041408   ;;  %v1016_v6 = vld [vmem:[#allocation3] sm:$0xff]  }
  0x2d   : > { %502 = vmatprep.mubr.bf16.mxu0 %v1147_v0  ;;  %1013 = vset.pattern.permute.xlu0 %v1147_v0  ;;  %vm438_vm1 = vcmask 31744   ;;  %v302_v7 = vld [vmem:[%s1412_s2] sm:$0xff]  ;;  %v304_v8 = vld [vmem:[%s1412_s2 + $0x10] sm:$0xff]  ;;  %v303_v9 = vld [vmem:[%s1412_s2 + $0x8] sm:$0xff] }
  0x2e   : > { %s1429_s18 = smov (!%p260_p3, %s1134_s18), 1  ;;  %1014 = vset.pattern.permute.xlu1 %v1147_v0  ;;  %830 = vmatprep.mubr.bf16.mxu1 %v1147_v0  ;;  %v305_v10 = vld [vmem:[%s1412_s2 + $0x18] sm:$0xff]  ;;  %v1017_v11 = vld [vmem:[#allocation3 + $0x8] sm:$0xff]   ;;  %v306_v12 = vld [vmem:[%s1412_s2 + $0x20] sm:$0xff] }
  0x2f   : > { %s973_s15 = sshll.u32 %s1429_s18, 3  ;;  %320 = vperm.xlu0 %1013, %v302_v7   ;;  %330 = vperm.xlu1 %1014, %v304_v8   ;;  %v307_v13 = vld [vmem:[%s1412_s2 + $0x28] sm:$0xff]  ;;  %v308_v14 = vld [vmem:[%s1412_s2 + $0x30] sm:$0xff]  ;;  %v309_v15 = vld [vmem:[%s1412_s2 + $0x38] sm:$0xff] }
  0x30   : > { %s267_s21 = scalar_lea.vmem %s1410_s0, %s973_s15  ;;  %v1018_v16 = vld [vmem:[#allocation3 + $0x10] sm:$0xff]   ;;  %v310_v17 = vld [vmem:[%s1412_s2 + $0x40] sm:$0xff]  ;;  %v311_v18 = vld [vmem:[%s1412_s2 + $0x48] sm:$0xff]  ;;  %s277_s17 = scalar_lea.vmem %s1415_s5, %s973_s15 }
  0x31   : > { %v280_v1 = vld [vmem:[%s267_s21] sm:$0xff]  ;;  %v312_v19 = vld [vmem:[%s1412_s2 + $0x50] sm:$0xff]  ;;  %v313_v20 = vld [vmem:[%s1412_s2 + $0x58] sm:$0xff] }
  0x32   : > { %v282_v2 = vcombine.high %v280_v1, %v280_v1  ;;  %v284_v3 = vpack.c.bf16 %v280_v1, %v280_v1  ;;  %v1019_v21 = vld [vmem:[#allocation3 + $0x18] sm:$0xff]   ;;  %v314_v22 = vld [vmem:[%s1412_s2 + $0x60] sm:$0xff]  ;;  %v315_v23 = vld [vmem:[%s1412_s2 + $0x68] sm:$0xff] }
  0x33   : > { %325 = vperm.xlu0 %1013, %v303_v9   ;;  %335 = vperm.xlu1 %1014, %v305_v10   ;;  %v316_v24 = vld [vmem:[%s1412_s2 + $0x70] sm:$0xff]  ;;  %v317_v25 = vld [vmem:[%s1412_s2 + $0x78] sm:$0xff]  ;;  %v1020_v26 = vld [vmem:[#allocation3 + $0x20] sm:$0xff]  }
  0x34   : > { %v285_v4 = vpack.c.bf16 %v282_v2, %v282_v2  ;;  %v465_v5 = vsel %vm463_vm0, %v284_v3, 0  ;;  %v792_v27 = vld [vmem:[%s1414_s4] sm:$0xf]  ;;  %v1021_v28 = vld [vmem:[#allocation3 + $0x28] sm:$0xff]   ;;  %v1022_v29 = vld [vmem:[#allocation3 + $0x30] sm:$0xff]  }
  0x35   : > { %v1023_v30 = vld [vmem:[#allocation3 + $0x38] sm:$0xff]  }
  0x36   : > { %962 = vmatprep.subr.msk.bf16.mxu0 %vm463_vm0, %v285_v4 }
  0x37   : > { %471 = vmatpush1.bf16.msra.mxu0 %v465_v5  ;;  %340 = vperm.xlu0 %1013, %v306_v12  }
  0x38   : > { %345 = vperm.xlu1 %1014, %v307_v13  }
  0x3a   : > { %963 = vmatmul.mubr.msk.bf16.vlgmr.msra.gmra.mrb[0].mxu0 %vm438_vm1, %v1016_v6 }
  0x3b   : > { %512 = vmatprep.mubr.bf16.mxu0 %v1147_v0  ;;  %350 = vperm.xlu0 %1013, %v308_v14  }
  0x3c   : > { %355 = vperm.xlu1 %1014, %v309_v15  }
  0x3f   : > { %360 = vperm.xlu0 %1013, %v310_v17  }
  0x40   : > { %365 = vperm.xlu1 %1014, %v311_v18  }
  0x42   : > { %964 = vmatmul.mubr.msk.bf16.gmra.mrb[4].mxu0 %vm438_vm1, %v1017_v11 }
  0x43   : > { %522 = vmatprep.mubr.bf16.mxu0 %v1147_v0  ;;  %370 = vperm.xlu0 %1013, %v312_v19  }
  0x44   : > { %375 = vperm.xlu1 %1014, %v313_v20  }
  0x47   : > { %380 = vperm.xlu0 %1013, %v314_v22  }
  0x48   : > { %385 = vperm.xlu1 %1014, %v315_v23  }
  0x4a   : > { %965 = vmatmul.mubr.msk.bf16.gmra.mrb[8].mxu0 %vm438_vm1, %v1018_v16 }
  0x4b   : > { %532 = vmatprep.mubr.bf16.mxu0 %v1147_v0  ;;  %390 = vperm.xlu0 %1013, %v316_v24  }
  0x4c   : > { %395 = vperm.xlu1 %1014, %v317_v25  }
  0x4f   : > { %795 = vperm.xlu0 %1013, %v792_v27  }
  0x52   : > { %966 = vmatmul.mubr.msk.bf16.gmra.mrb[12].mxu0 %vm438_vm1, %v1019_v21 }
  0x53   : > { %542 = vmatprep.mubr.bf16.mxu0 %v1147_v0 }
  0x5a   : > { %967 = vmatmul.mubr.msk.bf16.gmra.mrb[16].mxu0 %vm438_vm1, %v1020_v26 }
  0x5b   : > { %552 = vmatprep.mubr.bf16.mxu0 %v1147_v0 }
  0x62   : > { %968 = vmatmul.mubr.msk.bf16.gmra.mrb[20].mxu0 %vm438_vm1, %v1021_v28 }
  0x63   : > { %562 = vmatprep.mubr.bf16.mxu0 %v1147_v0 }
  0x6a   : > { %969 = vmatmul.mubr.msk.bf16.gmra.mrb[24].mxu0 %vm438_vm1, %v1022_v29 }
  0x6b   : > { %572 = vmatprep.mubr.bf16.mxu0 %v1147_v0 }
  0x72   : > { %970 = vmatmul.mubr.msk.bf16.gmra.mrb[28].mxu0 %vm438_vm1, %v1023_v30 }
  0xae   : > { %v321_v31 = vpop.permute.xlu0 %320  ;;  %v331_v42 = vpop.permute.xlu1 %330 }
  0xb2   : > { %v326_v35 = vpop.permute.xlu0 %325  ;;  %v336_v49 = vpop.permute.xlu1 %335 }
  0xb6   : > { %v341_v61 = vpop.permute.xlu0 %340 }
  0xb7   : > { %v346_v5 = vpop.permute.xlu1 %345 }
  0xba   : > { %v351_v28 = vpop.permute.xlu0 %350 }
 0x10d   : > { %v504_v32 = vpop.f32.mrb[0].mxu0 }
 0x10e   : > { %v505_v33 = vadd.f32 %v504_v32, %v321_v31  ;;  %v506_v34 = vpop.f32.mrb[1].mxu0 }
 0x10f   : > { %v507_v36 = vadd.f32 %v506_v34, %v321_v31  ;;  %v508_v37 = vpop.f32.mrb[2].mxu0 }
 0x110   : > { %v615_v38 = vmul.f32 0.70710677, %v505_v33  ;;  %v509_v39 = vadd.f32 %v508_v37, %v326_v35  ;;  %v510_v40 = vpop.f32.mrb[3].mxu0  ;;  %v583_v15 = vmul.f32 0.5, %v505_v33 }
 0x111   : > { %v616_v41 = vmul.f32 0.70710677, %v507_v36  ;;  %v511_v43 = vadd.f32 %v510_v40, %v326_v35  ;;  %v584_v4 = vmul.f32 0.5, %v507_v36 }
 0x112   : > { %1024 = verf.f32 %v615_v38  ;;  %v617_v44 = vmul.f32 0.70710677, %v509_v39  ;;  %v585_v16 = vmul.f32 0.5, %v509_v39 }
 0x113   : > { %1026 = verf.f32 %v616_v41  ;;  %v618_v45 = vmul.f32 0.70710677, %v511_v43  ;;  %v586_v10 = vmul.f32 0.5, %v511_v43 }
 0x114   : > { %1028 = verf.f32 %v617_v44 }
 0x115   : > { %1030 = verf.f32 %v618_v45  ;;  %v514_v46 = vpop.f32.mrb[4].mxu0  ;;  %v356_v45 = vpop.permute.xlu1 %355 }
 0x116   : > { %v515_v47 = vadd.f32 %v514_v46, %v331_v42  ;;  %v516_v48 = vpop.f32.mrb[5].mxu0 }
 0x117   : > { %v1317_v50 = vadd.f32 %v516_v48, %v331_v42  ;;  %v518_v51 = vpop.f32.mrb[6].mxu0 }
 0x118   : > { %v619_v52 = vmul.f32 0.70710677, %v515_v47  ;;  %v519_v53 = vadd.f32 %v518_v51, %v336_v49  ;;  %v520_v54 = vpop.f32.mrb[7].mxu0  ;;  %v587_v37 = vmul.f32 0.5, %v515_v47 }
 0x119   : > { %v620_v55 = vmul.f32 0.70710677, %v1317_v50  ;;  %v521_v56 = vadd.f32 %v520_v54, %v336_v49  ;;  %v588_v42 = vmul.f32 0.5, %v1317_v50 }
 0x11a   : > { %1032 = verf.f32 %v619_v52  ;;  %v621_v57 = vmul.f32 0.70710677, %v519_v53  ;;  %v589_v38 = vmul.f32 0.5, %v519_v53 }
 0x11b   : > { %1034 = verf.f32 %v620_v55  ;;  %v622_v58 = vmul.f32 0.70710677, %v521_v56  ;;  %v590_v43 = vmul.f32 0.5, %v521_v56 }
 0x11c   : > { %v1025_v59 = vpop.eup %1024  ;;  %1036 = verf.f32 %v621_v57 }
 0x11d   : > { %v1027_v60 = vpop.eup %1026  ;;  %1038 = verf.f32 %v622_v58  ;;  %v524_v62 = vpop.f32.mrb[8].mxu0  ;;  %v679_v8 = vadd.f32 1.0, %v1025_v59 }
 0x11e   : > { %v1029_v63 = vpop.eup %1028  ;;  %v1320_v0 = vadd.f32 %v524_v62, %v341_v61  ;;  %v526_v1 = vpop.f32.mrb[9].mxu0  ;;  %v680_v2 = vadd.f32 1.0, %v1027_v60 }
 0x11f   : > { %v1031_v3 = vpop.eup %1030  ;;  %v1322_v6 = vadd.f32 %v526_v1, %v341_v61  ;;  %v528_v7 = vpop.f32.mrb[10].mxu0  ;;  %v681_v9 = vadd.f32 1.0, %v1029_v63  ;;  %v711_v23 = vmul.f32 %v679_v8, %v583_v15 }
 0x120   : > { %v623_v11 = vmul.f32 0.70710677, %v1320_v0  ;;  %v1325_v12 = vadd.f32 %v528_v7, %v346_v5  ;;  %v530_v13 = vpop.f32.mrb[11].mxu0  ;;  %v682_v14 = vadd.f32 1.0, %v1031_v3  ;;  %v712_v20 = vmul.f32 %v680_v2, %v584_v4  ;;  %v361_v61 = vpop.permute.xlu0 %360 }
 0x121   : > { %v624_v17 = vmul.f32 0.70710677, %v1322_v6  ;;  %v1328_v18 = vadd.f32 %v530_v13, %v346_v5  ;;  %v713_v24 = vmul.f32 %v681_v9, %v585_v16  ;;  %v591_v7 = vmul.f32 0.5, %v1320_v0 }
 0x122   : > { %1040 = verf.f32 %v623_v11  ;;  %v625_v19 = vmul.f32 0.70710677, %v1325_v12  ;;  %v714_v21 = vmul.f32 %v682_v14, %v586_v10  ;;  %v593_v8 = vmul.f32 0.5, %v1325_v12  ;;  %v366_v14 = vpop.permute.xlu1 %365 }
 0x123   : > { %1042 = verf.f32 %v624_v17  ;;  %v626_v22 = vmul.f32 0.70710677, %v1328_v18  ;;  %v743_v31 = vpack.c.bf16 %v713_v24, %v711_v23  ;;  %v592_v13 = vmul.f32 0.5, %v1322_v6 }
 0x124   : > { %v1033_v25 = vpop.eup %1032  ;;  %1044 = verf.f32 %v625_v19  ;;  %v744_v26 = vpack.c.bf16 %v714_v21, %v712_v20  ;;  %v594_v15 = vmul.f32 0.5, %v1328_v18 }
 0x125   : > { %v1035_v27 = vpop.eup %1034  ;;  %v683_v29 = vadd.f32 1.0, %v1033_v25  ;;  %1046 = verf.f32 %v626_v22  ;;  %v534_v30 = vpop.f32.mrb[12].mxu0 }
 0x126   : > { %v1037_v32 = vpop.eup %1036  ;;  %v684_v33 = vadd.f32 1.0, %v1035_v27  ;;  %v1332_v34 = vadd.f32 %v534_v30, %v351_v28  ;;  %v536_v35 = vpop.f32.mrb[13].mxu0  ;;  %798 = vmatprep.subr.bf16.mxu1 %v744_v26 }
 0x127   : > { %v1039_v36 = vpop.eup %1038  ;;  %v685_v39 = vadd.f32 1.0, %v1037_v32  ;;  %v1334_v40 = vadd.f32 %v536_v35, %v351_v28  ;;  %v538_v41 = vpop.f32.mrb[14].mxu0  ;;  %799 = vmatpush1.bf16.msra.mxu1 %v743_v31  ;;  %v715_v49 = vmul.f32 %v683_v29, %v587_v37 }
 0x128   : > { %v686_v44 = vadd.f32 1.0, %v1039_v36  ;;  %v627_v46 = vmul.f32 0.70710677, %v1332_v34  ;;  %v540_v48 = vpop.f32.mrb[15].mxu0  ;;  %v1339_v54 = vadd.f32 %v538_v41, %v356_v45  ;;  %v716_v47 = vmul.f32 %v684_v33, %v588_v42  ;;  %v371_v29 = vpop.permute.xlu0 %370 }
 0x129   : > { %v717_v51 = vmul.f32 %v685_v39, %v589_v38  ;;  %v628_v52 = vmul.f32 0.70710677, %v1334_v40  ;;  %v1341_v55 = vadd.f32 %v540_v48, %v356_v45  ;;  %v595_v36 = vmul.f32 0.5, %v1332_v34  ;;  %v376_v42 = vpop.permute.xlu1 %375 }
 0x12a   : > { %v718_v53 = vmul.f32 %v686_v44, %v590_v43  ;;  %1048 = verf.f32 %v627_v46  ;;  %v629_v50 = vmul.f32 0.70710677, %v1339_v54  ;;  %v596_v43 = vmul.f32 0.5, %v1334_v40 }
 0x12b   : > { %1050 = verf.f32 %v628_v52  ;;  %v745_v56 = vpack.c.bf16 %v717_v51, %v715_v49  ;;  %v630_v58 = vmul.f32 0.70710677, %v1341_v55  ;;  %v597_v44 = vmul.f32 0.5, %v1339_v54 }
 0x12c   : > { %v1041_v57 = vpop.eup %1040  ;;  %v746_v59 = vpack.c.bf16 %v718_v53, %v716_v47  ;;  %1052 = verf.f32 %v629_v50  ;;  %v598_v49 = vmul.f32 0.5, %v1341_v55 }
 0x12d   : > { %v1043_v60 = vpop.eup %1042  ;;  %v687_v62 = vadd.f32 1.0, %v1041_v57  ;;  %v544_v63 = vpop.f32.mrb[16].mxu0  ;;  %1054 = verf.f32 %v630_v58 }
 0x12e   : > { %v1045_v1 = vpop.eup %1044  ;;  %v688_v2 = vadd.f32 1.0, %v1043_v60  ;;  %v1345_v3 = vadd.f32 %v544_v63, %v361_v61  ;;  %v546_v4 = vpop.f32.mrb[17].mxu0  ;;  %800 = vmatprep.subr.bf16.mxu1 %v746_v59 }
 0x12f   : > { %v1047_v5 = vpop.eup %1046  ;;  %v689_v9 = vadd.f32 1.0, %v1045_v1  ;;  %v1349_v10 = vadd.f32 %v546_v4, %v361_v61  ;;  %v548_v11 = vpop.f32.mrb[18].mxu0  ;;  %801 = vmatpush1.bf16.msra.mxu1 %v745_v56  ;;  %v719_v20 = vmul.f32 %v687_v62, %v591_v7 }
 0x130   : > { %v690_v16 = vadd.f32 1.0, %v1047_v5  ;;  %v631_v17 = vmul.f32 0.70710677, %v1345_v3  ;;  %v550_v19 = vpop.f32.mrb[19].mxu0  ;;  %v1355_v22 = vadd.f32 %v548_v11, %v366_v14  ;;  %v720_v12 = vmul.f32 %v688_v2, %v592_v13  ;;  %v381_v60 = vpop.permute.xlu0 %380 }
 0x131   : > { %v721_v21 = vmul.f32 %v689_v9, %v593_v8  ;;  %v632_v0 = vmul.f32 0.70710677, %v1349_v10  ;;  %v1357_v24 = vadd.f32 %v550_v19, %v366_v14  ;;  %v599_v5 = vmul.f32 0.5, %v1345_v3  ;;  %v386_v13 = vpop.permute.xlu1 %385 }
 0x132   : > { %v722_v23 = vmul.f32 %v690_v16, %v594_v15  ;;  %1056 = verf.f32 %v631_v17  ;;  %v633_v6 = vmul.f32 0.70710677, %v1355_v22  ;;  %v600_v14 = vmul.f32 0.5, %v1349_v10 }
 0x133   : > { %1058 = verf.f32 %v632_v0  ;;  %v747_v25 = vpack.c.bf16 %v721_v21, %v719_v20  ;;  %v634_v26 = vmul.f32 0.70710677, %v1357_v24  ;;  %v601_v15 = vmul.f32 0.5, %v1355_v22 }
 0x134   : > { %v1049_v18 = vpop.eup %1048  ;;  %v748_v27 = vpack.c.bf16 %v722_v23, %v720_v12  ;;  %1060 = verf.f32 %v633_v6  ;;  %v602_v20 = vmul.f32 0.5, %v1357_v24 }
 0x135   : > { %v1051_v28 = vpop.eup %1050  ;;  %v554_v30 = vpop.f32.mrb[20].mxu0  ;;  %v691_v31 = vadd.f32 1.0, %v1049_v18  ;;  %1062 = verf.f32 %v634_v26 }
 0x136   : > { %v1361_v32 = vadd.f32 %v554_v30, %v371_v29  ;;  %v556_v33 = vpop.f32.mrb[21].mxu0  ;;  %802 = vmatprep.subr.bf16.mxu1 %v748_v27  ;;  %v1053_v35 = vpop.eup %1052  ;;  %v692_v37 = vadd.f32 1.0, %v1051_v28 }
 0x137   : > { %v1364_v38 = vadd.f32 %v556_v33, %v371_v29  ;;  %v558_v39 = vpop.f32.mrb[22].mxu0  ;;  %803 = vmatpush1.bf16.msra.mxu1 %v747_v25  ;;  %v1055_v41 = vpop.eup %1054  ;;  %v693_v45 = vadd.f32 1.0, %v1053_v35  ;;  %v723_v47 = vmul.f32 %v691_v31, %v595_v36 }
 0x138   : > { %v635_v46 = vmul.f32 0.70710677, %v1361_v32  ;;  %v560_v48 = vpop.f32.mrb[23].mxu0  ;;  %v694_v51 = vadd.f32 1.0, %v1055_v41  ;;  %v1371_v52 = vadd.f32 %v558_v39, %v376_v42  ;;  %v724_v56 = vmul.f32 %v692_v37, %v596_v43  ;;  %v391_v29 = vpop.permute.xlu0 %390 }
 0x139   : > { %v636_v34 = vmul.f32 0.70710677, %v1364_v38  ;;  %v725_v53 = vmul.f32 %v693_v45, %v597_v44  ;;  %v1373_v50 = vadd.f32 %v560_v48, %v376_v42  ;;  %v603_v37 = vmul.f32 0.5, %v1361_v32  ;;  %v396_v44 = vpop.permute.xlu1 %395 }
 0x13a   : > { %1064 = verf.f32 %v635_v46  ;;  %v726_v40 = vmul.f32 %v694_v51, %v598_v49  ;;  %v637_v54 = vmul.f32 0.70710677, %v1371_v52  ;;  %v604_v45 = vmul.f32 0.5, %v1364_v38 }
 0x13b   : > { %1066 = verf.f32 %v636_v34  ;;  %v638_v58 = vmul.f32 0.70710677, %v1373_v50  ;;  %v749_v59 = vpack.c.bf16 %v725_v53, %v723_v47  ;;  %v605_v46 = vmul.f32 0.5, %v1371_v52 }
 0x13c   : > { %v1057_v57 = vpop.eup %1056  ;;  %1068 = verf.f32 %v637_v54  ;;  %v750_v62 = vpack.c.bf16 %v726_v40, %v724_v56  ;;  %v606_v34 = vmul.f32 0.5, %v1373_v50 }
 0x13d   : > { %v1059_v55 = vpop.eup %1058  ;;  %v564_v61 = vpop.f32.mrb[24].mxu0  ;;  %v695_v63 = vadd.f32 1.0, %v1057_v57  ;;  %1070 = verf.f32 %v638_v58 }
 0x13e   : > { %v1377_v1 = vadd.f32 %v564_v61, %v381_v60  ;;  %v566_v2 = vpop.f32.mrb[25].mxu0  ;;  %v1061_v4 = vpop.eup %1060  ;;  %v696_v7 = vadd.f32 1.0, %v1059_v55  ;;  %804 = vmatprep.subr.bf16.mxu1 %v750_v62 }
 0x13f   : > { %v1380_v8 = vadd.f32 %v566_v2, %v381_v60  ;;  %v568_v9 = vpop.f32.mrb[26].mxu0  ;;  %v1063_v11 = vpop.eup %1062  ;;  %v697_v16 = vadd.f32 1.0, %v1061_v4  ;;  %805 = vmatpush1.bf16.msra.mxu1 %v749_v59  ;;  %v727_v12 = vmul.f32 %v695_v63, %v599_v5 }
 0x140   : > { %v639_v17 = vmul.f32 0.70710677, %v1377_v1  ;;  %v570_v19 = vpop.f32.mrb[27].mxu0  ;;  %v698_v21 = vadd.f32 1.0, %v1063_v11  ;;  %v569_v0 = vadd.f32 %v568_v9, %v386_v13  ;;  %v728_v25 = vmul.f32 %v696_v7, %v600_v14 }
 0x141   : > { %v640_v3 = vmul.f32 0.70710677, %v1380_v8  ;;  %v729_v23 = vmul.f32 %v697_v16, %v601_v15  ;;  %v571_v6 = vadd.f32 %v570_v19, %v386_v13  ;;  %v607_v4 = vmul.f32 0.5, %v1377_v1 }
 0x142   : > { %1072 = verf.f32 %v639_v17  ;;  %v730_v18 = vmul.f32 %v698_v21, %v602_v20  ;;  %v641_v10 = vmul.f32 0.70710677, %v569_v0  ;;  %v609_v5 = vmul.f32 0.5, %v569_v0 }
 0x143   : > { %1074 = verf.f32 %v640_v3  ;;  %v642_v26 = vmul.f32 0.70710677, %v571_v6  ;;  %v751_v27 = vpack.c.bf16 %v729_v23, %v727_v12  ;;  %v608_v9 = vmul.f32 0.5, %v1380_v8 }
 0x144   : > { %v1065_v22 = vpop.eup %1064  ;;  %1076 = verf.f32 %v641_v10  ;;  %v752_v24 = vpack.c.bf16 %v730_v18, %v728_v25  ;;  %v610_v11 = vmul.f32 0.5, %v571_v6 }
 0x145   : > { %v1067_v28 = vpop.eup %1066  ;;  %v574_v30 = vpop.f32.mrb[28].mxu0  ;;  %v699_v31 = vadd.f32 1.0, %v1065_v22  ;;  %1078 = verf.f32 %v642_v26 }
 0x146   : > { %v575_v33 = vadd.f32 %v574_v30, %v391_v29  ;;  %v576_v35 = vpop.f32.mrb[29].mxu0  ;;  %v1069_v36 = vpop.eup %1068  ;;  %v700_v39 = vadd.f32 1.0, %v1067_v28  ;;  %806 = vmatprep.subr.bf16.mxu1 %v752_v24 }
 0x147   : > { %v577_v41 = vadd.f32 %v576_v35, %v391_v29  ;;  %v578_v42 = vpop.f32.mrb[30].mxu0  ;;  %v1071_v43 = vpop.eup %1070  ;;  %v701_v48 = vadd.f32 1.0, %v1069_v36  ;;  %807 = vmatpush1.bf16.msra.mxu1 %v751_v27  ;;  %v731_v32 = vmul.f32 %v699_v31, %v603_v37  ;;  %v775_v31 = vld [vmem:[%s1413_s3] sm:$0x3] }
 0x148   : > { %v643_v49 = vmul.f32 0.70710677, %v575_v33  ;;  %v580_v51 = vpop.f32.mrb[31].mxu0  ;;  %v702_v47 = vadd.f32 1.0, %v1071_v43  ;;  %v579_v56 = vadd.f32 %v578_v42, %v396_v44  ;;  %v732_v57 = vmul.f32 %v700_v39, %v604_v45 }
 0x149   : > { %v644_v53 = vmul.f32 0.70710677, %v577_v41  ;;  %v733_v40 = vmul.f32 %v701_v48, %v605_v46  ;;  %v581_v54 = vadd.f32 %v580_v51, %v396_v44  ;;  %v611_v0 = vmul.f32 0.5, %v575_v33  ;;  %v796_v33 = vpop.permute.xlu0 %795 }
 0x14a   : > { %1080 = verf.f32 %v643_v49  ;;  %v734_v58 = vmul.f32 %v702_v47, %v606_v34  ;;  %v645_v59 = vmul.f32 0.70710677, %v579_v56  ;;  %v613_v18 = vmul.f32 0.5, %v579_v56 }
 0x14b   : > { %1082 = verf.f32 %v644_v53  ;;  %v646_v55 = vmul.f32 0.70710677, %v581_v54  ;;  %v753_v52 = vpack.c.bf16 %v733_v40, %v731_v32  ;;  %v612_v8 = vmul.f32 0.5, %v577_v41 }
 0x14c   : > { %v1073_v38 = vpop.eup %1072  ;;  %1084 = verf.f32 %v645_v59  ;;  %v754_v61 = vpack.c.bf16 %v734_v58, %v732_v57  ;;  %v614_v6 = vmul.f32 0.5, %v581_v54 }
 0x14d   : > { %v1075_v60 = vpop.eup %1074  ;;  %v703_v62 = vadd.f32 1.0, %v1073_v38  ;;  %1086 = verf.f32 %v646_v55 }
 0x14e   : > { %v1077_v50 = vpop.eup %1076  ;;  %v704_v63 = vadd.f32 1.0, %v1075_v60  ;;  %808 = vmatprep.subr.bf16.mxu1 %v754_v61 }
 0x14f   : > { %v1079_v2 = vpop.eup %1078  ;;  %v705_v7 = vadd.f32 1.0, %v1077_v50  ;;  %809 = vmatpush1.bf16.msra.mxu1 %v753_v52  ;;  %v735_v14 = vmul.f32 %v703_v62, %v607_v4 }
 0x150   : > { %v706_v13 = vadd.f32 1.0, %v1079_v2  ;;  %v736_v16 = vmul.f32 %v704_v63, %v608_v9 }
 0x151   : > { %v737_v15 = vmul.f32 %v705_v7, %v609_v5 }
 0x152   : > { %v738_v17 = vmul.f32 %v706_v13, %v610_v11 }
 0x153   : > { %v755_v20 = vpack.c.bf16 %v737_v15, %v735_v14 }
 0x154   : > { %v1081_v19 = vpop.eup %1080  ;;  %v756_v3 = vpack.c.bf16 %v738_v17, %v736_v16 }
 0x155   : > { %v1083_v21 = vpop.eup %1082  ;;  %v707_v12 = vadd.f32 1.0, %v1081_v19 }
 0x156   : > { %v1085_v23 = vpop.eup %1084  ;;  %v708_v25 = vadd.f32 1.0, %v1083_v21  ;;  %810 = vmatprep.subr.bf16.mxu1 %v756_v3 }
 0x157   : > { %v1087_v1 = vpop.eup %1086  ;;  %v709_v10 = vadd.f32 1.0, %v1085_v23  ;;  %811 = vmatpush1.bf16.msra.mxu1 %v755_v20  ;;  %v739_v26 = vmul.f32 %v707_v12, %v611_v0 }
 0x158   : > { %v710_v22 = vadd.f32 1.0, %v1087_v1  ;;  %v740_v28 = vmul.f32 %v708_v25, %v612_v8 }
 0x159   : > { %v741_v27 = vmul.f32 %v709_v10, %v613_v18 }
 0x15a   : > { %v742_v29 = vmul.f32 %v710_v22, %v614_v6 }
 0x15b   : > { %v757_v30 = vpack.c.bf16 %v741_v27, %v739_v26 }
 0x15c   : > { %v758_v24 = vpack.c.bf16 %v742_v29, %v740_v28 }
 0x15e   : > { %812 = vmatprep.subr.bf16.mxu1 %v758_v24 }
 0x15f   : > { %813 = vmatpush1.bf16.msra.mxu1 %v757_v30 }
 0x162   : > { %831 = vmatmul.mubr.bf16.vlgmr.msra.gmra.mrb[0].mxu1 %v775_v31 }
 0x235   : > { %v832_v35 = vpop.f32.mrb[0].mxu1 }
 0x236   : > { %v833_v36 = vadd.f32 %v832_v35, %v796_v33  ;;  %v834_v37 = vpop.f32.mrb[1].mxu1 }
 0x237   : > { %v835_v39 = vadd.f32 %v834_v37, %v796_v33  ;;  %v836_v41 = vpop.f32.mrb[2].mxu1 }
 0x238   : > { %v837_v42 = vpop.f32.mrb[3].mxu1 }
 0x239   : > { %v841_v43 = vcombine.low %v833_v36, %v835_v39 }
 0x23b   : > { %843 = vst [vmem:[%s277_s17] sm:$0xff] %v841_v43 }
 0x23c PF: > { %s16_s20 = sadd.s32 1, %s1142_s20   ;;  %s1424_s18 = smov %s1138_s19 }
 0x23d   : > { %p13_p4 = scmp.ge.s32.totalorder %s16_s20, 4   ;;  %s1425_s19 = smov %s1427_s22 }
 0x23f   :  { %15 = sbr.rel (!%p13_p4) target bundleno = 2 (0x2), region = 75 }
 0x246   :  { %874 = vsyncpa [#allocation4], 1 }
 0x247   :  { %876 = vsyncpa [#allocation4 + $0x1], 1 }

</bundles_post_ra>
